<compile_context>
chip_gen: v6e
topology: v6e:2x2x1
jax: 0.10.0
libtpu: 0.0.40
codegen_flags: <defaults>
</compile_context>

<pallas_src>
import jax
import jax.numpy as jnp
from jax import lax
from jax.experimental import pallas as pl
from jax.experimental.pallas import tpu as pltpu

D_IN = 1900        # config.NET_MLP['mlp_input_size'] = 1900 (fixed by the module)
D_PAD = 1920       # 15 * 128: lane-aligned padded feature width
HIDDEN = 256       # config.NET_MLP['mlp_hidden_size'] (deterministic choice)
LN_EPS = 1e-5      # nn.LayerNorm default eps
DEFAULT_TB = 1024  # batch tile; sized for v7x's 64 MiB VMEM with double buffering
# TODO(synk): mlp_hidden_act comes from config; fixed to 'relu' here.


def _round_up(n, m):
    return (n + m - 1) // m * m


def mlp_kernel(x_ref, w2_ref, b2_ref, g_ref, beta_ref, w3_ref, b3_ref, o_ref):
    # act(x.transpose(-2,-1)).transpose(-2,-1) == act(x) since act is elementwise.
    a = jnp.maximum(x_ref[...], 0)                          # (TB, D_PAD) bf16 relu

    # fc2 on the MXU: bf16 x bf16 operands, f32 accumulation.
    h = jnp.dot(a, w2_ref[...], preferred_element_type=jnp.float32)
    h = jnp.maximum(h + b2_ref[...], 0.0)                   # (TB, H) f32, act

    # LayerNorm over H in f32, one-pass statistics: var = E[h^2] - mean^2.
    mean = jnp.mean(h, axis=-1, keepdims=True)
    var = jnp.mean(h * h, axis=-1, keepdims=True) - mean * mean
    hn = (h - mean) * lax.rsqrt(var + LN_EPS)
    hn = hn * g_ref[...] + beta_ref[...]

    # fc3 (H -> 1): VPU multiply + lane reduction (avoid an N=1 MXU matmul).
    y = jnp.sum(hn * w3_ref[...], axis=-1, keepdims=True) + b3_ref[...]
    o_ref[...] = y                                          # (TB, 1) f32


def mlp_no_attention_unirep(x, w2, b2, gamma, beta, w3, b3, *, tb=DEFAULT_TB):
    """Forward pass of MLPNoAttention_unirep as a batch-tiled Pallas kernel.

    x: (B, D) float with D <= 1920 (1900 for the real module).
    w2: (D, HIDDEN) pre-transposed fc2 weight (in, out layout).
    b2/gamma/beta: (HIDDEN,); w3: (HIDDEN,) or (HIDDEN, 1); b3: scalar-like.
    Returns (B,) float32.
    """
    x = jnp.asarray(x)
    B, d = x.shape

    # Feature padding to 1920 + bf16 cast (halves HBM bytes for the dominant
    # operand; accumulation stays f32 inside the kernel).
    xp = jnp.pad(x.astype(jnp.bfloat16), ((0, 0), (0, D_PAD - d)))
    w2p = jnp.pad(jnp.asarray(w2, jnp.bfloat16),
                  ((0, D_PAD - w2.shape[0]), (0, 0)))

    b2r = jnp.asarray(b2, jnp.float32).reshape(1, HIDDEN)
    gr = jnp.asarray(gamma, jnp.float32).reshape(1, HIDDEN)
    br = jnp.asarray(beta, jnp.float32).reshape(1, HIDDEN)
    w3r = jnp.asarray(w3, jnp.float32).reshape(1, HIDDEN)
    b3r = jnp.asarray(b3, jnp.float32).reshape(1, 1)

    # Batch tiling: a single tile for small B, TB-row tiles otherwise.
    if B <= tb:
        TB = _round_up(B, 8)
    else:
        TB = _round_up(tb, 8)
    B_pad = _round_up(B, TB)
    if B_pad != B:
        xp = jnp.pad(xp, ((0, B_pad - B), (0, 0)))

    grid = (B_pad // TB,)
    const = lambda i: (0, 0)   # weights stay resident in VMEM across grid steps

    out = pl.pallas_call(
        mlp_kernel,
        out_shape=jax.ShapeDtypeStruct((B_pad, 1), jnp.float32),
        grid_spec=pltpu.PrefetchScalarGridSpec(
            num_scalar_prefetch=0,
            grid=grid,
            in_specs=[
                pl.BlockSpec((TB, D_PAD), lambda i: (i, 0)),   # x (tiled, double-buffered)
                pl.BlockSpec((D_PAD, HIDDEN), const),          # w2 (resident)
                pl.BlockSpec((1, HIDDEN), const),              # b2
                pl.BlockSpec((1, HIDDEN), const),              # gamma
                pl.BlockSpec((1, HIDDEN), const),              # beta
                pl.BlockSpec((1, HIDDEN), const),              # w3 as a row
                pl.BlockSpec((1, 1), const),                   # b3
            ],
            out_specs=pl.BlockSpec((TB, 1), lambda i: (i, 0)),
        ),
        compiler_params=pltpu.CompilerParams(
            dimension_semantics=("parallel",),
        ),
    )(xp, w2p, b2r, gr, br, w3r, b3r)

    # fc3(...).squeeze(-1).squeeze(-1): (B_pad, 1) -> (B,)
    return out[:B, 0]


def mlp_reference(x, w2, b2, gamma, beta, w3, b3):
    """Pure-JAX f32 reference matching the PyTorch forward."""
    a = jnp.maximum(x, 0.0)
    h = jnp.maximum(a @ w2 + b2.reshape(1, HIDDEN), 0.0)
    mean = jnp.mean(h, axis=-1, keepdims=True)
    var = jnp.mean((h - mean) ** 2, axis=-1, keepdims=True)
    hn = (h - mean) / jnp.sqrt(var + LN_EPS)
    hn = hn * gamma.reshape(1, HIDDEN) + beta.reshape(1, HIDDEN)
    y = hn @ jnp.asarray(w3).reshape(HIDDEN, 1) + jnp.asarray(b3).reshape(1, 1)
    return y[:, 0]


def init_params(key):
    """Deterministic init mimicking PyTorch defaults.

    nn.Linear: U(-1/sqrt(fan_in), 1/sqrt(fan_in)); nn.LayerNorm: weight=1, bias=0.
    Weights are stored pre-transposed as (in, out).
    """
    k_w2, k_b2, k_w3, k_b3 = jax.random.split(key, 4)

    bound2 = 1.0 / (D_IN ** 0.5)
    w2 = jax.random.uniform(k_w2, (D_IN, HIDDEN), jnp.float32, -bound2, bound2)
    b2 = jax.random.uniform(k_b2, (HIDDEN,), jnp.float32, -bound2, bound2)

    gamma = jnp.ones((HIDDEN,), jnp.float32)
    beta = jnp.zeros((HIDDEN,), jnp.float32)

    bound3 = 1.0 / (HIDDEN ** 0.5)
    w3 = jax.random.uniform(k_w3, (HIDDEN, 1), jnp.float32, -bound3, bound3)
    b3 = jax.random.uniform(k_b3, (1,), jnp.float32, -bound3, bound3)

    return w2, b2, gamma, beta, w3, b3


if __name__ == "__main__":
    key = jax.random.PRNGKey(0)
    k_x, k_x2, k_p = jax.random.split(key, 3)

    params = init_params(k_p)

    # Small single-tile case.
    B = 8
    x = jax.random.normal(k_x, (B, D_IN), jnp.float32)
    y = jax.block_until_ready(mlp_no_attention_unirep(x, *params))
    assert y.shape == (B,), y.shape
    assert bool(jnp.all(jnp.isfinite(y)))
    y_ref = mlp_reference(x, *params)
    assert bool(jnp.max(jnp.abs(y - y_ref)) < 0.1), (y, y_ref)

    # Multi-tile case (tiny tb just to exercise the pipelined grid + batch pad).
    B2 = 20
    x2 = jax.random.normal(k_x2, (B2, D_IN), jnp.float32)
    y2 = jax.block_until_ready(mlp_no_attention_unirep(x2, *params, tb=8))
    assert y2.shape == (B2,), y2.shape
    y2_ref = mlp_reference(x2, *params)
    assert bool(jnp.max(jnp.abs(y2 - y2_ref)) < 0.1), (y2, y2_ref)

    print("KERNEL_OK")
</pallas_src>

<mosaic_0001>
module attributes {stable_mosaic.version = 11 : i64} {
  func.func @mlp_kernel(%arg0: i32, %arg1: memref<8x1920xbf16, #tpu.memory_space<vmem>>, %arg2: memref<1920x256xbf16, #tpu.memory_space<vmem>>, %arg3: memref<1x256xf32, #tpu.memory_space<vmem>>, %arg4: memref<1x256xf32, #tpu.memory_space<vmem>>, %arg5: memref<1x256xf32, #tpu.memory_space<vmem>>, %arg6: memref<1x256xf32, #tpu.memory_space<vmem>>, %arg7: memref<1x1xf32, #tpu.memory_space<vmem>>, %arg8: memref<8x1xf32, #tpu.memory_space<vmem>>) attributes {dimension_semantics = [#tpu.dimension_semantics<parallel>], iteration_bounds = array<i64: 1>, scalar_prefetch = 0 : i64, scratch_operands = 0 : i64, tpu.core_type = #tpu.core_type<tc>, window_params = [{transform_indices = @transform_0, window_bounds = array<i64: 8, 1920>}, {pipeline_mode = #tpu.pipeline_mode<synchronous>, transform_indices = @transform_1, window_bounds = array<i64: 1920, 256>}, {pipeline_mode = #tpu.pipeline_mode<synchronous>, transform_indices = @transform_2, window_bounds = array<i64: 1, 256>}, {pipeline_mode = #tpu.pipeline_mode<synchronous>, transform_indices = @transform_3, window_bounds = array<i64: 1, 256>}, {pipeline_mode = #tpu.pipeline_mode<synchronous>, transform_indices = @transform_4, window_bounds = array<i64: 1, 256>}, {pipeline_mode = #tpu.pipeline_mode<synchronous>, transform_indices = @transform_5, window_bounds = array<i64: 1, 256>}, {pipeline_mode = #tpu.pipeline_mode<synchronous>, transform_indices = @transform_6, window_bounds = array<i64: 1, 1>}, {transform_indices = @transform_7, window_bounds = array<i64: 8, 1>}]} {
    %c0 = arith.constant 0 : index
    %c0_0 = arith.constant 0 : index
    %0 = vector.load %arg1[%c0, %c0_0] : memref<8x1920xbf16, #tpu.memory_space<vmem>>, vector<8x1920xbf16>
    %cst = arith.constant 0.000000e+00 : bf16
    %1 = vector.broadcast %cst : bf16 to vector<8x1920xbf16>
    %2 = arith.maximumf %0, %1 : vector<8x1920xbf16>
    %c0_1 = arith.constant 0 : index
    %c0_2 = arith.constant 0 : index
    %3 = vector.load %arg2[%c0_1, %c0_2] : memref<1920x256xbf16, #tpu.memory_space<vmem>>, vector<1920x256xbf16>
    %cst_3 = arith.constant dense<0.000000e+00> : vector<8x256xf32>
    %4 = tpu.matmul %2, %3, %cst_3 {dimension_numbers = #tpu.dot_dimension_numbers<[1], [0], [0], [1], [0, 0, 1, 1], [], []>} : vector<8x1920xbf16>, vector<1920x256xbf16>, vector<8x256xf32> -> vector<8x256xf32>
    %c0_4 = arith.constant 0 : index
    %c0_5 = arith.constant 0 : index
    %5 = vector.load %arg3[%c0_4, %c0_5] : memref<1x256xf32, #tpu.memory_space<vmem>>, vector<1x256xf32>
    %6 = vector.broadcast %5 : vector<1x256xf32> to vector<8x256xf32>
    %7 = arith.addf %4, %6 : vector<8x256xf32>
    %cst_6 = arith.constant 0.000000e+00 : f32
    %8 = vector.broadcast %cst_6 : f32 to vector<8x256xf32>
    %9 = arith.maximumf %7, %8 : vector<8x256xf32>
    %cst_7 = arith.constant dense<0.000000e+00> : vector<8xf32>
    %10 = vector.multi_reduction <add>, %9, %cst_7 [1] : vector<8x256xf32> to vector<8xf32>
    %11 = vector.shape_cast %10 : vector<8xf32> to vector<8x1xf32>
    %cst_8 = arith.constant 2.560000e+02 : f32
    %12 = vector.broadcast %cst_8 : f32 to vector<8x1xf32>
    %13 = arith.divf %11, %12 : vector<8x1xf32>
    %14 = arith.mulf %9, %9 : vector<8x256xf32>
    %cst_9 = arith.constant dense<0.000000e+00> : vector<8xf32>
    %15 = vector.multi_reduction <add>, %14, %cst_9 [1] : vector<8x256xf32> to vector<8xf32>
    %16 = vector.shape_cast %15 : vector<8xf32> to vector<8x1xf32>
    %cst_10 = arith.constant 2.560000e+02 : f32
    %17 = vector.broadcast %cst_10 : f32 to vector<8x1xf32>
    %18 = arith.divf %16, %17 : vector<8x1xf32>
    %19 = arith.mulf %13, %13 : vector<8x1xf32>
    %20 = arith.subf %18, %19 : vector<8x1xf32>
    %21 = vector.broadcast %13 : vector<8x1xf32> to vector<8x256xf32>
    %22 = arith.subf %9, %21 : vector<8x256xf32>
    %cst_11 = arith.constant 9.99999974E-6 : f32
    %23 = vector.broadcast %cst_11 : f32 to vector<8x1xf32>
    %24 = arith.addf %20, %23 : vector<8x1xf32>
    %25 = math.rsqrt %24 : vector<8x1xf32>
    %26 = vector.broadcast %25 : vector<8x1xf32> to vector<8x256xf32>
    %27 = arith.mulf %22, %26 : vector<8x256xf32>
    %c0_12 = arith.constant 0 : index
    %c0_13 = arith.constant 0 : index
    %28 = vector.load %arg4[%c0_12, %c0_13] : memref<1x256xf32, #tpu.memory_space<vmem>>, vector<1x256xf32>
    %29 = vector.broadcast %28 : vector<1x256xf32> to vector<8x256xf32>
    %30 = arith.mulf %27, %29 : vector<8x256xf32>
    %c0_14 = arith.constant 0 : index
    %c0_15 = arith.constant 0 : index
    %31 = vector.load %arg5[%c0_14, %c0_15] : memref<1x256xf32, #tpu.memory_space<vmem>>, vector<1x256xf32>
    %32 = vector.broadcast %31 : vector<1x256xf32> to vector<8x256xf32>
    %33 = arith.addf %30, %32 : vector<8x256xf32>
    %c0_16 = arith.constant 0 : index
    %c0_17 = arith.constant 0 : index
    %34 = vector.load %arg6[%c0_16, %c0_17] : memref<1x256xf32, #tpu.memory_space<vmem>>, vector<1x256xf32>
    %35 = vector.broadcast %34 : vector<1x256xf32> to vector<8x256xf32>
    %36 = arith.mulf %33, %35 : vector<8x256xf32>
    %cst_18 = arith.constant dense<0.000000e+00> : vector<8xf32>
    %37 = vector.multi_reduction <add>, %36, %cst_18 [1] : vector<8x256xf32> to vector<8xf32>
    %38 = vector.shape_cast %37 : vector<8xf32> to vector<8x1xf32>
    %c0_19 = arith.constant 0 : index
    %c0_20 = arith.constant 0 : index
    %39 = vector.load %arg7[%c0_19, %c0_20] : memref<1x1xf32, #tpu.memory_space<vmem>>, vector<1x1xf32>
    %40 = vector.broadcast %39 : vector<1x1xf32> to vector<8x1xf32>
    %41 = arith.addf %38, %40 : vector<8x1xf32>
    %c0_21 = arith.constant 0 : index
    %c0_22 = arith.constant 0 : index
    %42 = vector.load %arg8[%c0_21, %c0_22] : memref<8x1xf32, #tpu.memory_space<vmem>>, vector<8x1xf32>
    tpu.vector_store %arg8[%c0_21, %c0_22], %41 {strides = array<i32>} : memref<8x1xf32, #tpu.memory_space<vmem>>, vector<8x1xf32>,
    return
  }
  func.func @transform_0(%arg0: i32) -> (i32, i32) {
    %c0_i32 = arith.constant 0 : i32
    %c0_i32_0 = arith.constant 0 : i32
    return %arg0, %c0_i32 : i32, i32
  }
  func.func @transform_1(%arg0: i32) -> (i32, i32) {
    %c0_i32 = arith.constant 0 : i32
    %c0_i32_0 = arith.constant 0 : i32
    %c0_i32_1 = arith.constant 0 : i32
    return %c0_i32, %c0_i32_0 : i32, i32
  }
  func.func @transform_2(%arg0: i32) -> (i32, i32) {
    %c0_i32 = arith.constant 0 : i32
    %c0_i32_0 = arith.constant 0 : i32
    %c0_i32_1 = arith.constant 0 : i32
    return %c0_i32, %c0_i32_0 : i32, i32
  }
  func.func @transform_3(%arg0: i32) -> (i32, i32) {
    %c0_i32 = arith.constant 0 : i32
    %c0_i32_0 = arith.constant 0 : i32
    %c0_i32_1 = arith.constant 0 : i32
    return %c0_i32, %c0_i32_0 : i32, i32
  }
  func.func @transform_4(%arg0: i32) -> (i32, i32) {
    %c0_i32 = arith.constant 0 : i32
    %c0_i32_0 = arith.constant 0 : i32
    %c0_i32_1 = arith.constant 0 : i32
    return %c0_i32, %c0_i32_0 : i32, i32
  }
  func.func @transform_5(%arg0: i32) -> (i32, i32) {
    %c0_i32 = arith.constant 0 : i32
    %c0_i32_0 = arith.constant 0 : i32
    %c0_i32_1 = arith.constant 0 : i32
    return %c0_i32, %c0_i32_0 : i32, i32
  }
  func.func @transform_6(%arg0: i32) -> (i32, i32) {
    %c0_i32 = arith.constant 0 : i32
    %c0_i32_0 = arith.constant 0 : i32
    %c0_i32_1 = arith.constant 0 : i32
    return %c0_i32, %c0_i32_0 : i32, i32
  }
  func.func @transform_7(%arg0: i32) -> (i32, i32) {
    %c0_i32 = arith.constant 0 : i32
    %c0_i32_0 = arith.constant 0 : i32
    return %arg0, %c0_i32 : i32, i32
  }
}

</mosaic_0001>

<bundles_post_ra>
// kernel: tpu_custom_call.1
= control target key start
LH: loop header
LB: loop body
LE: loop exit
PB: predicated region body
PF: predicated region fallthrough
CT: control target
= control target key end

     0   :  { %s2773_s0 = inlined_call_operand.hbm [shape: bf16[8,1920], index: 0, kind: input, shape index: {}]   ;;  %s2774_s1 = inlined_call_operand.hbm [shape: bf16[1920,256], index: 1, kind: input, shape index: {}]   ;;  %s2775_s2 = inlined_call_operand.vmem [shape: f32[1,256], index: 2, kind: input, shape index: {}]   ;;  %s2776_s3 = inlined_call_operand.vmem [shape: f32[1,256], index: 3, kind: input, shape index: {}]   ;;  %s2777_s4 = inlined_call_operand.vmem [shape: f32[1,256], index: 4, kind: input, shape index: {}]   ;;  %s2778_s5 = inlined_call_operand.vmem [shape: f32[1,256], index: 5, kind: input, shape index: {}]   ;;  %s2779_s6 = inlined_call_operand.<no memory space> [shape: f32[1,1], index: 6, kind: input, shape index: {}]   ;;  %s2780_s7 = inlined_call_operand.vmem [shape: f32[8,1], index: 7, kind: output, shape index: {}]  }
   0x1   :  { %v12_v0 = vstv %s2779_s6 }
   0x2   :  { %13 = vst [vmem:[#allocation2] sm:$0x1] %v12_v0 }
   0x3   :  { %14 = vsyncpa [#allocation4], 0 }
   0x4   :  { %15 = vsyncpa [#allocation6], 0  ;;  %s2653_s26 = smov [#allocation3]   ;;  %s2654_s28 = smov [#allocation5]  }
   0x5   :  { %s22_s27 = sshll.u32 %s2653_s26, 4  ;;  %s31_s29 = sshll.u32 %s2654_s28, 4  ;;  %s23_s27 = int_to_ptr.vmem [resolvable:$true] %s22_s27  ;;  %s32_s29 = int_to_ptr.vmem [resolvable:$true] %s31_s29 }
   0x6   :  { %s2617_s30 = scalar_lea.vmem %s23_s27, 960  ;;  %p2622_p1 = scmp.lt.s32.totalorder %s23_s27, %s23_s27 }
   0x7   :  { %p2618_p0 = scmp.ne.s32.totalorder %s23_s27, %s2617_s30  ;;  %p2623_p2 = scmp.lt.s32.totalorder %s2617_s30, %s2617_s30 }
   0x9   :  { %p2624_p3 = por %p2623_p2, %p2622_p1 }
   0xb   :  { %p2625_p4 = pnand %p2624_p3, %p2618_p0 }
   0xd   :  { %2628 = shalt.err (!%p2625_p4)
}
   0xe   :  { %25 = dma.hbm_to_vmem [thread:$0]  %s2773_s0, 960, %s23_s27, [#allocation4]  }
   0xf   :  { %s2637_s6 = scalar_lea.vmem %s32_s29, 30720  ;;  %p2642_p6 = scmp.lt.s32.totalorder %s32_s29, %s32_s29 }
  0x10   :  { %p2638_p5 = scmp.ne.s32.totalorder %s32_s29, %s2637_s6  ;;  %p2643_p7 = scmp.lt.s32.totalorder %s2637_s6, %s2637_s6 }
  0x12   :  { %p2644_p8 = por %p2643_p7, %p2642_p6 }
  0x14   :  { %p2645_p9 = pnand %p2644_p8, %p2638_p5 }
  0x16   :  { %2648 = shalt.err (!%p2645_p9)
}
  0x17   :  { %s2655_s10 = smov 128   ;;  %s2656_s11 = smov 8  }
  0x18   :  { %37 = dma.hbm_to_vmem [thread:$0]  %s2774_s1, 30720, %s32_s29, [#allocation6], %s2655_s10, %s2655_s10, %s2656_s11  }
  0x19   :  { %2649 = dma.done.wait [#allocation4], 960  }
  0x1a   :  { %2650 = vsyncadd [#allocation4], 4294966336 }
  0x1b   :  { %2651 = dma.done.wait [#allocation6], 30720  }
  0x1c   :  { %2652 = vsyncadd [#allocation6], 4294936576  ;;  %v2247_v1 = vld [vmem:[#allocation5 + $0x74] ss:$8 sps:$4 sm:$0xff]   ;;  %v2249_v2 = vld [vmem:[#allocation5 + $0x70] ss:$8 sps:$4 sm:$0xff]  }
  0x1d   :  { %1576 = vmatprep.subr.bf16.mxu0 %v2247_v1  ;;  %v2250_v3 = vld [vmem:[#allocation5 + $0x174] ss:$8 sps:$4 sm:$0xff]   ;;  %v2252_v4 = vld [vmem:[#allocation5 + $0x170] ss:$8 sps:$4 sm:$0xff]   ;;  %v2253_v5 = vld [vmem:[#allocation5 + $0x64] ss:$8 sps:$4 sm:$0xff]  }
  0x1e   :  { %1577 = vmatpush1.bf16.msra.mxu0 %v2249_v2  ;;  %v2255_v6 = vld [vmem:[#allocation5 + $0x60] ss:$8 sps:$4 sm:$0xff]   ;;  %1617 = vmatprep.subr.bf16.mxu1 %v2250_v3  ;;  %v2256_v7 = vld [vmem:[#allocation5 + $0x164] ss:$8 sps:$4 sm:$0xff]   ;;  %v2259_v9 = vld [vmem:[#allocation5 + $0x54] ss:$8 sps:$4 sm:$0xff]  }
  0x1f   :  { %1618 = vmatpush1.bf16.msra.mxu1 %v2252_v4  ;;  %1578 = vmatprep.subr.bf16.mxu0 %v2253_v5  ;;  %v2258_v8 = vld [vmem:[#allocation5 + $0x160] ss:$8 sps:$4 sm:$0xff]   ;;  %v2261_v10 = vld [vmem:[#allocation5 + $0x50] ss:$8 sps:$4 sm:$0xff]   ;;  %v2262_v11 = vld [vmem:[#allocation5 + $0x154] ss:$8 sps:$4 sm:$0xff]  }
  0x20   :  { %1619 = vmatprep.subr.bf16.mxu1 %v2256_v7  ;;  %v2265_v12 = vld [vmem:[#allocation5 + $0x44] ss:$8 sps:$4 sm:$0xff]   ;;  %v2264_v13 = vld [vmem:[#allocation5 + $0x150] ss:$8 sps:$4 sm:$0xff]   ;;  %v2267_v15 = vld [vmem:[#allocation5 + $0x40] ss:$8 sps:$4 sm:$0xff]  }
  0x21   :  { %v2268_v14 = vld [vmem:[#allocation5 + $0x144] ss:$8 sps:$4 sm:$0xff]   ;;  %v2271_v16 = vld [vmem:[#allocation5 + $0x34] ss:$8 sps:$4 sm:$0xff]   ;;  %v2270_v17 = vld [vmem:[#allocation5 + $0x140] ss:$8 sps:$4 sm:$0xff]  }
  0x22   :  { %1579 = vmatpush1.bf16.msra.mxu0 %v2255_v6  ;;  %v2274_v18 = vld [vmem:[#allocation5 + $0x134] ss:$8 sps:$4 sm:$0xff]   ;;  %v2273_v19 = vld [vmem:[#allocation5 + $0x30] ss:$8 sps:$4 sm:$0xff]   ;;  %v2277_v20 = vld [vmem:[#allocation5 + $0x24] ss:$8 sps:$4 sm:$0xff]  }
  0x23   :  { %1580 = vmatprep.subr.bf16.mxu0 %v2259_v9  ;;  %1620 = vmatpush1.bf16.msra.mxu1 %v2258_v8  ;;  %v2276_v21 = vld [vmem:[#allocation5 + $0x130] ss:$8 sps:$4 sm:$0xff]   ;;  %v2280_v22 = vld [vmem:[#allocation5 + $0x124] ss:$8 sps:$4 sm:$0xff]   ;;  %v2279_v23 = vld [vmem:[#allocation5 + $0x20] ss:$8 sps:$4 sm:$0xff]  }
  0x24   :  { %1621 = vmatprep.subr.bf16.mxu1 %v2262_v11  ;;  %v2283_v24 = vld [vmem:[#allocation5 + $0x14] ss:$8 sps:$4 sm:$0xff]   ;;  %v2282_v25 = vld [vmem:[#allocation5 + $0x120] ss:$8 sps:$4 sm:$0xff]   ;;  %v2285_v27 = vld [vmem:[#allocation5 + $0x10] ss:$8 sps:$4 sm:$0xff]  }
  0x25   :  { %v2286_v26 = vld [vmem:[#allocation5 + $0x114] ss:$8 sps:$4 sm:$0xff]   ;;  %v2289_v28 = vld [vmem:[#allocation5 + $0x4] ss:$8 sps:$4 sm:$0xff]   ;;  %v2288_v29 = vld [vmem:[#allocation5 + $0x110] ss:$8 sps:$4 sm:$0xff]  }
  0x26   :  { %1581 = vmatpush1.bf16.msra.mxu0 %v2261_v10  ;;  %v2292_v30 = vld [vmem:[#allocation5 + $0x104] ss:$8 sps:$4 sm:$0xff]   ;;  %v2291_v31 = vld [vmem:[#allocation5] ss:$8 sps:$4 sm:$0xff]   ;;  %v2295_v32 = vld [vmem:[#allocation5 + $0xf4] ss:$8 sps:$4 sm:$0xff]  }
  0x27   :  { %1582 = vmatprep.subr.bf16.mxu0 %v2265_v12  ;;  %1622 = vmatpush1.bf16.msra.mxu1 %v2264_v13  ;;  %v2294_v33 = vld [vmem:[#allocation5 + $0x100] ss:$8 sps:$4 sm:$0xff]   ;;  %v2298_v34 = vld [vmem:[#allocation5 + $0x1f4] ss:$8 sps:$4 sm:$0xff]   ;;  %v2297_v35 = vld [vmem:[#allocation5 + $0xf0] ss:$8 sps:$4 sm:$0xff]  }
  0x28   :  { %1623 = vmatprep.subr.bf16.mxu1 %v2268_v14  ;;  %v2301_v36 = vld [vmem:[#allocation5 + $0xe4] ss:$8 sps:$4 sm:$0xff]   ;;  %v2300_v37 = vld [vmem:[#allocation5 + $0x1f0] ss:$8 sps:$4 sm:$0xff]   ;;  %v2303_v39 = vld [vmem:[#allocation5 + $0xe0] ss:$8 sps:$4 sm:$0xff]  }
  0x29   :  { %v2304_v38 = vld [vmem:[#allocation5 + $0x1e4] ss:$8 sps:$4 sm:$0xff]   ;;  %v2307_v40 = vld [vmem:[#allocation5 + $0xd4] ss:$8 sps:$4 sm:$0xff]   ;;  %v2306_v41 = vld [vmem:[#allocation5 + $0x1e0] ss:$8 sps:$4 sm:$0xff]  }
  0x2a   :  { %1583 = vmatpush1.bf16.msra.mxu0 %v2267_v15  ;;  %v2310_v42 = vld [vmem:[#allocation5 + $0x1d4] ss:$8 sps:$4 sm:$0xff]   ;;  %v2309_v43 = vld [vmem:[#allocation5 + $0xd0] ss:$8 sps:$4 sm:$0xff]   ;;  %v2313_v44 = vld [vmem:[#allocation5 + $0xc4] ss:$8 sps:$4 sm:$0xff]  }
  0x2b   :  { %1584 = vmatprep.subr.bf16.mxu0 %v2271_v16  ;;  %1624 = vmatpush1.bf16.msra.mxu1 %v2270_v17  ;;  %v2312_v45 = vld [vmem:[#allocation5 + $0x1d0] ss:$8 sps:$4 sm:$0xff]   ;;  %v2316_v46 = vld [vmem:[#allocation5 + $0x1c4] ss:$8 sps:$4 sm:$0xff]   ;;  %v2315_v48 = vld [vmem:[#allocation5 + $0xc0] ss:$8 sps:$4 sm:$0xff]  }
  0x2c   :  { %1625 = vmatprep.subr.bf16.mxu1 %v2274_v18  ;;  %v55_v47 = vld [vmem:[#allocation3] sm:$0xff]  ;;  %v2657_v49 = vmov 0   ;;  %v2319_v51 = vld [vmem:[#allocation5 + $0xb4] ss:$8 sps:$4 sm:$0xff]   ;;  %v56_v52 = vld [vmem:[#allocation3 + $0x8] sm:$0xff]  ;;  %vm1978_vm0 = vcmask 7168  }
  0x2d   :  { %v63_v50 = vmax.bf16 %v2657_v49, %v55_v47  ;;  %v2318_v53 = vld [vmem:[#allocation5 + $0x1c0] ss:$8 sps:$4 sm:$0xff]   ;;  %v64_v55 = vmax.bf16 %v2657_v49, %v56_v52  ;;  %v2322_v56 = vld [vmem:[#allocation5 + $0x1b4] ss:$8 sps:$4 sm:$0xff]   ;;  %v2321_v57 = vld [vmem:[#allocation5 + $0xb0] ss:$8 sps:$4 sm:$0xff]  }
  0x2e   :  { %1585 = vmatpush1.bf16.msra.mxu0 %v2273_v19  ;;  %v2325_v59 = vld [vmem:[#allocation5 + $0xa4] ss:$8 sps:$4 sm:$0xff]   ;;  %v2324_v60 = vld [vmem:[#allocation5 + $0x1b0] ss:$8 sps:$4 sm:$0xff]   ;;  %v2327_v62 = vld [vmem:[#allocation5 + $0xa0] ss:$8 sps:$4 sm:$0xff]  }
  0x2f   :  { %1586 = vmatprep.subr.bf16.mxu0 %v2277_v20  ;;  %1626 = vmatpush1.bf16.msra.mxu1 %v2276_v21  ;;  %v1987_v54 = vcombine.high %v63_v50, %v63_v50  ;;  %v1989_v58 = vcombine.high %v64_v55, %v64_v55  ;;  %v2328_v61 = vld [vmem:[#allocation5 + $0x1a4] ss:$8 sps:$4 sm:$0xff]   ;;  %v2331_v63 = vld [vmem:[#allocation5 + $0x94] ss:$8 sps:$4 sm:$0xff]   ;;  %v2330_v0 = vld [vmem:[#allocation5 + $0x1a0] ss:$8 sps:$4 sm:$0xff]   ;;  %v1986_v9 = vcombine.low %v63_v50, %v63_v50 }
  0x30   :  { %1627 = vmatprep.subr.bf16.mxu1 %v2280_v22  ;;  %v2334_v1 = vld [vmem:[#allocation5 + $0x194] ss:$8 sps:$4 sm:$0xff]   ;;  %v2333_v2 = vld [vmem:[#allocation5 + $0x90] ss:$8 sps:$4 sm:$0xff]   ;;  %v2337_v3 = vld [vmem:[#allocation5 + $0x84] ss:$8 sps:$4 sm:$0xff]   ;;  %v1988_v12 = vcombine.low %v64_v55, %v64_v55 }
  0x31   :  { %1608 = vmatprep.mubr.bf16.mxu0 %v1987_v54  ;;  %1649 = vmatprep.mubr.bf16.mxu1 %v1989_v58  ;;  %v2336_v4 = vld [vmem:[#allocation5 + $0x190] ss:$8 sps:$4 sm:$0xff]   ;;  %v2340_v5 = vld [vmem:[#allocation5 + $0x184] ss:$8 sps:$4 sm:$0xff]   ;;  %v2339_v6 = vld [vmem:[#allocation5 + $0x80] ss:$8 sps:$4 sm:$0xff]  }
  0x32   :  { %1587 = vmatpush1.bf16.msra.mxu0 %v2279_v23  ;;  %v2345_v7 = vld [vmem:[#allocation5 + $0x274] ss:$8 sps:$4 sm:$0xff]   ;;  %v2342_v8 = vld [vmem:[#allocation5 + $0x180] ss:$8 sps:$4 sm:$0xff]   ;;  %v2343_v11 = vld [vmem:[#allocation5 + $0x270] ss:$8 sps:$4 sm:$0xff]  }
  0x33   :  { %1588 = vmatprep.subr.bf16.mxu0 %v2283_v24  ;;  %1628 = vmatpush1.bf16.msra.mxu1 %v2282_v25  ;;  %v2348_v10 = vld [vmem:[#allocation5 + $0x374] ss:$8 sps:$4 sm:$0xff]   ;;  %v2351_v13 = vld [vmem:[#allocation5 + $0x264] ss:$8 sps:$4 sm:$0xff]   ;;  %v2346_v14 = vld [vmem:[#allocation5 + $0x370] ss:$8 sps:$4 sm:$0xff]  }
  0x34   :  { %1629 = vmatprep.subr.bf16.mxu1 %v2286_v26  ;;  %v2354_v15 = vld [vmem:[#allocation5 + $0x364] ss:$8 sps:$4 sm:$0xff]   ;;  %v2349_v16 = vld [vmem:[#allocation5 + $0x260] ss:$8 sps:$4 sm:$0xff]   ;;  %v2357_v17 = vld [vmem:[#allocation5 + $0x254] ss:$8 sps:$4 sm:$0xff]  }
  0x35   :  { %v2352_v18 = vld [vmem:[#allocation5 + $0x360] ss:$8 sps:$4 sm:$0xff]   ;;  %v2360_v19 = vld [vmem:[#allocation5 + $0x354] ss:$8 sps:$4 sm:$0xff]   ;;  %v2355_v20 = vld [vmem:[#allocation5 + $0x250] ss:$8 sps:$4 sm:$0xff]  }
  0x36   :  { %1589 = vmatpush1.bf16.msra.mxu0 %v2285_v27  ;;  %v2363_v21 = vld [vmem:[#allocation5 + $0x244] ss:$8 sps:$4 sm:$0xff]   ;;  %v2358_v22 = vld [vmem:[#allocation5 + $0x350] ss:$8 sps:$4 sm:$0xff]   ;;  %v2361_v24 = vld [vmem:[#allocation5 + $0x240] ss:$8 sps:$4 sm:$0xff]  }
  0x37   :  { %1590 = vmatprep.subr.bf16.mxu0 %v2289_v28  ;;  %1630 = vmatpush1.bf16.msra.mxu1 %v2288_v29  ;;  %v2366_v23 = vld [vmem:[#allocation5 + $0x344] ss:$8 sps:$4 sm:$0xff]   ;;  %v2369_v25 = vld [vmem:[#allocation5 + $0x234] ss:$8 sps:$4 sm:$0xff]   ;;  %v2364_v26 = vld [vmem:[#allocation5 + $0x340] ss:$8 sps:$4 sm:$0xff]  }
  0x38   :  { %1631 = vmatprep.subr.bf16.mxu1 %v2292_v30  ;;  %v2372_v27 = vld [vmem:[#allocation5 + $0x334] ss:$8 sps:$4 sm:$0xff]   ;;  %v2367_v28 = vld [vmem:[#allocation5 + $0x230] ss:$8 sps:$4 sm:$0xff]   ;;  %v2375_v29 = vld [vmem:[#allocation5 + $0x224] ss:$8 sps:$4 sm:$0xff]  }
  0x39   :  { %v2370_v30 = vld [vmem:[#allocation5 + $0x330] ss:$8 sps:$4 sm:$0xff]   ;;  %v2393_v47 = vld [vmem:[#allocation5 + $0x2f4] ss:$8 sps:$4 sm:$0xff]   ;;  %v2399_v52 = vld [vmem:[#allocation5 + $0x2e4] ss:$8 sps:$4 sm:$0xff]  }
  0x3a   :  { %1591 = vmatpush1.bf16.msra.mxu0 %v2291_v31  ;;  %v2378_v31 = vld [vmem:[#allocation5 + $0x324] ss:$8 sps:$4 sm:$0xff]   ;;  %v2396_v50 = vld [vmem:[#allocation5 + $0x3f4] ss:$8 sps:$4 sm:$0xff]   ;;  %v2397_v55 = vld [vmem:[#allocation5 + $0x2e0] ss:$8 sps:$4 sm:$0xff]  }
  0x3b   :  { %1592 = vmatprep.subr.bf16.mxu0 %v2295_v32  ;;  %1632 = vmatpush1.bf16.msra.mxu1 %v2294_v33  ;;  %v2373_v32 = vld [vmem:[#allocation5 + $0x220] ss:$8 sps:$4 sm:$0xff]   ;;  %v2381_v33 = vld [vmem:[#allocation5 + $0x214] ss:$8 sps:$4 sm:$0xff]   ;;  %v2402_v54 = vld [vmem:[#allocation5 + $0x3e4] ss:$8 sps:$4 sm:$0xff]  }
  0x3c   :  { %1633 = vmatprep.subr.bf16.mxu1 %v2298_v34  ;;  %v2376_v34 = vld [vmem:[#allocation5 + $0x320] ss:$8 sps:$4 sm:$0xff]   ;;  %v2408_v58 = vld [vmem:[#allocation5 + $0x3d4] ss:$8 sps:$4 sm:$0xff]  }
  0x3e   :  { %1593 = vmatpush2.bf16.msra.mxu0 %v2297_v35  ;;  %v2384_v35 = vld [vmem:[#allocation5 + $0x314] ss:$8 sps:$4 sm:$0xff]  }
  0x3f   :  { %1594 = vmatprep.subr.bf16.mxu0 %v2301_v36  ;;  %1634 = vmatpush2.bf16.msra.mxu1 %v2300_v37  ;;  %v57_v36 = vld [vmem:[#allocation3 + $0x10] sm:$0xff] }
  0x40   :  { %1635 = vmatprep.subr.bf16.mxu1 %v2304_v38  ;;  %v2379_v37 = vld [vmem:[#allocation5 + $0x210] ss:$8 sps:$4 sm:$0xff]   ;;  %v2710_v38 = vmax.bf16 %v2657_v49, %v57_v36  ;;  %v2459_v36 = vld [vmem:[#allocation5 + $0x444] ss:$8 sps:$4 sm:$0xff]  }
  0x42   :  { %1595 = vmatpush2.bf16.msra.mxu0 %v2303_v39  ;;  %v58_v39 = vld [vmem:[#allocation3 + $0x18] sm:$0xff] }
  0x43   :  { %1596 = vmatprep.subr.bf16.mxu0 %v2307_v40  ;;  %1636 = vmatpush2.bf16.msra.mxu1 %v2306_v41  ;;  %v2387_v40 = vld [vmem:[#allocation5 + $0x204] ss:$8 sps:$4 sm:$0xff]   ;;  %v2713_v41 = vmax.bf16 %v2657_v49, %v58_v39  ;;  %v2457_v39 = vld [vmem:[#allocation5 + $0x440] ss:$8 sps:$4 sm:$0xff]  }
  0x44   :  { %1637 = vmatprep.subr.bf16.mxu1 %v2310_v42  ;;  %v2382_v42 = vld [vmem:[#allocation5 + $0x310] ss:$8 sps:$4 sm:$0xff]  }
  0x46   :  { %1597 = vmatpush2.bf16.msra.mxu0 %v2309_v43  ;;  %v1991_v43 = vcombine.high %v2710_v38, %v2710_v38 }
  0x47   :  { %1598 = vmatprep.subr.bf16.mxu0 %v2313_v44  ;;  %1638 = vmatpush2.bf16.msra.mxu1 %v2312_v45  ;;  %v2390_v44 = vld [vmem:[#allocation5 + $0x304] ss:$8 sps:$4 sm:$0xff]   ;;  %v1993_v45 = vcombine.high %v2713_v41, %v2713_v41 }
  0x48   :  { %1639 = vmatprep.subr.bf16.mxu1 %v2316_v46  ;;  %v2385_v46 = vld [vmem:[#allocation5 + $0x200] ss:$8 sps:$4 sm:$0xff]  }
  0x4a   :  { %1599 = vmatpush2.bf16.msra.mxu0 %v2315_v48  ;;  %v2388_v48 = vld [vmem:[#allocation5 + $0x300] ss:$8 sps:$4 sm:$0xff]  }
  0x4b   :  { %1600 = vmatprep.subr.bf16.mxu0 %v2319_v51  ;;  %1640 = vmatpush2.bf16.msra.mxu1 %v2318_v53  ;;  %v2391_v51 = vld [vmem:[#allocation5 + $0x2f0] ss:$8 sps:$4 sm:$0xff]  }
  0x4c   :  { %1641 = vmatprep.subr.bf16.mxu1 %v2322_v56  ;;  %v2394_v53 = vld [vmem:[#allocation5 + $0x3f0] ss:$8 sps:$4 sm:$0xff]   ;;  %v2405_v56 = vld [vmem:[#allocation5 + $0x2d4] ss:$8 sps:$4 sm:$0xff]  }
  0x4e   :  { %1601 = vmatpush2.bf16.msra.mxu0 %v2321_v57  ;;  %v2400_v57 = vld [vmem:[#allocation5 + $0x3e0] ss:$8 sps:$4 sm:$0xff]  }
  0x4f   :  { %1602 = vmatprep.subr.bf16.mxu0 %v2325_v59  ;;  %1642 = vmatpush2.bf16.msra.mxu1 %v2324_v60  ;;  %v2403_v59 = vld [vmem:[#allocation5 + $0x2d0] ss:$8 sps:$4 sm:$0xff]   ;;  %v2411_v60 = vld [vmem:[#allocation5 + $0x2c4] ss:$8 sps:$4 sm:$0xff]  }
  0x50   :  { %1643 = vmatprep.subr.bf16.mxu1 %v2328_v61  ;;  %v2406_v61 = vld [vmem:[#allocation5 + $0x3d0] ss:$8 sps:$4 sm:$0xff]  }
  0x52   :  { %1603 = vmatpush2.bf16.msra.mxu0 %v2327_v62  ;;  %v2414_v62 = vld [vmem:[#allocation5 + $0x3c4] ss:$8 sps:$4 sm:$0xff]  }
  0x53   :  { %1604 = vmatprep.subr.bf16.mxu0 %v2331_v63  ;;  %1644 = vmatpush2.bf16.msra.mxu1 %v2330_v0  ;;  %v2409_v63 = vld [vmem:[#allocation5 + $0x2c0] ss:$8 sps:$4 sm:$0xff]   ;;  %v2417_v0 = vld [vmem:[#allocation5 + $0x2b4] ss:$8 sps:$4 sm:$0xff]  }
  0x54   :  { %1645 = vmatprep.subr.bf16.mxu1 %v2334_v1  ;;  %v2412_v1 = vld [vmem:[#allocation5 + $0x3c0] ss:$8 sps:$4 sm:$0xff]  }
  0x56   :  { %1605 = vmatpush2.bf16.msra.mxu0 %v2333_v2  ;;  %v2420_v2 = vld [vmem:[#allocation5 + $0x3b4] ss:$8 sps:$4 sm:$0xff]  }
  0x57   :  { %1606 = vmatprep.subr.bf16.mxu0 %v2337_v3  ;;  %1646 = vmatpush2.bf16.msra.mxu1 %v2336_v4  ;;  %v2415_v3 = vld [vmem:[#allocation5 + $0x2b0] ss:$8 sps:$4 sm:$0xff]   ;;  %v2423_v4 = vld [vmem:[#allocation5 + $0x2a4] ss:$8 sps:$4 sm:$0xff]  }
  0x58   :  { %1647 = vmatprep.subr.bf16.mxu1 %v2340_v5  ;;  %v2418_v5 = vld [vmem:[#allocation5 + $0x3b0] ss:$8 sps:$4 sm:$0xff]  }
  0x5a   :  { %1607 = vmatpush2.bf16.msra.mxu0 %v2339_v6  ;;  %v2426_v6 = vld [vmem:[#allocation5 + $0x3a4] ss:$8 sps:$4 sm:$0xff]  }
  0x5b   :  { %1658 = vmatprep.subr.bf16.mxu0 %v2345_v7  ;;  %1648 = vmatpush2.bf16.msra.mxu1 %v2342_v8  ;;  %v2421_v7 = vld [vmem:[#allocation5 + $0x2a0] ss:$8 sps:$4 sm:$0xff]   ;;  %v2429_v8 = vld [vmem:[#allocation5 + $0x294] ss:$8 sps:$4 sm:$0xff]  }
  0x5c   :  { %1699 = vmatprep.subr.bf16.mxu1 %v2348_v10  ;;  %v2432_v10 = vld [vmem:[#allocation5 + $0x394] ss:$8 sps:$4 sm:$0xff]  }
  0x5d   :  { %1609 = vmatmul.mubr.bf16.vlgmr.msra.gmra.mxu0 %v1986_v9  ;;  %v2424_v9 = vld [vmem:[#allocation5 + $0x3a0] ss:$8 sps:$4 sm:$0xff]  }
  0x5e   :  { %1659 = vmatpush1.bf16.msra.mxu0 %v2343_v11  ;;  %1650 = vmatmul.mubr.bf16.vlgmr.msra.gmra.mxu1 %v1988_v12  ;;  %v2427_v11 = vld [vmem:[#allocation5 + $0x290] ss:$8 sps:$4 sm:$0xff]   ;;  %v2435_v12 = vld [vmem:[#allocation5 + $0x284] ss:$8 sps:$4 sm:$0xff]  }
  0x5f   :  { %1660 = vmatprep.subr.bf16.mxu0 %v2351_v13  ;;  %1700 = vmatpush1.bf16.msra.mxu1 %v2346_v14  ;;  %v2430_v13 = vld [vmem:[#allocation5 + $0x390] ss:$8 sps:$4 sm:$0xff]   ;;  %v2438_v14 = vld [vmem:[#allocation5 + $0x384] ss:$8 sps:$4 sm:$0xff]  }
  0x60   :  { %1701 = vmatprep.subr.bf16.mxu1 %v2354_v15  ;;  %1690 = vmatprep.mubr.bf16.mxu0 %v1991_v43  ;;  %v2433_v15 = vld [vmem:[#allocation5 + $0x280] ss:$8 sps:$4 sm:$0xff]   ;;  %v2463_v43 = vld [vmem:[#allocation5 + $0x430] ss:$8 sps:$4 sm:$0xff]  }
  0x61   :  { %1731 = vmatprep.mubr.bf16.mxu1 %v1993_v45  ;;  %v2466_v45 = vld [vmem:[#allocation5 + $0x530] ss:$8 sps:$4 sm:$0xff]  }
  0x62   :  { %1661 = vmatpush1.bf16.msra.mxu0 %v2349_v16  ;;  %v2441_v16 = vld [vmem:[#allocation5 + $0x474] ss:$8 sps:$4 sm:$0xff]  }
  0x63   :  { %1662 = vmatprep.subr.bf16.mxu0 %v2357_v17  ;;  %1702 = vmatpush1.bf16.msra.mxu1 %v2352_v18  ;;  %v2436_v17 = vld [vmem:[#allocation5 + $0x380] ss:$8 sps:$4 sm:$0xff]   ;;  %v1990_v18 = vcombine.low %v2710_v38, %v2710_v38  ;;  %v2462_v38 = vld [vmem:[#allocation5 + $0x544] ss:$8 sps:$4 sm:$0xff]  }
  0x64   :  { %1703 = vmatprep.subr.bf16.mxu1 %v2360_v19  ;;  %v2444_v19 = vld [vmem:[#allocation5 + $0x574] ss:$8 sps:$4 sm:$0xff]  }
  0x66   :  { %1663 = vmatpush1.bf16.msra.mxu0 %v2355_v20  ;;  %v2439_v20 = vld [vmem:[#allocation5 + $0x470] ss:$8 sps:$4 sm:$0xff]  }
  0x67   :  { %1664 = vmatprep.subr.bf16.mxu0 %v2363_v21  ;;  %1704 = vmatpush1.bf16.msra.mxu1 %v2358_v22  ;;  %v1992_v21 = vcombine.low %v2713_v41, %v2713_v41  ;;  %v2447_v22 = vld [vmem:[#allocation5 + $0x464] ss:$8 sps:$4 sm:$0xff]   ;;  %v2460_v41 = vld [vmem:[#allocation5 + $0x540] ss:$8 sps:$4 sm:$0xff]  }
  0x68   :  { %1705 = vmatprep.subr.bf16.mxu1 %v2366_v23  ;;  %v2442_v23 = vld [vmem:[#allocation5 + $0x570] ss:$8 sps:$4 sm:$0xff]  }
  0x6a   :  { %1665 = vmatpush1.bf16.msra.mxu0 %v2361_v24  ;;  %v59_v24 = vld [vmem:[#allocation3 + $0x20] sm:$0xff] }
  0x6b   :  { %1666 = vmatprep.subr.bf16.mxu0 %v2369_v25  ;;  %1706 = vmatpush1.bf16.msra.mxu1 %v2364_v26  ;;  %v2445_v25 = vld [vmem:[#allocation5 + $0x460] ss:$8 sps:$4 sm:$0xff]   ;;  %v2450_v26 = vld [vmem:[#allocation5 + $0x564] ss:$8 sps:$4 sm:$0xff]  }
  0x6c   :  { %1707 = vmatprep.subr.bf16.mxu1 %v2372_v27  ;;  %v2724_v27 = vmax.bf16 %v2657_v49, %v59_v24  ;;  %v2534_v24 = vld [vmem:[#allocation5 + $0x584] ss:$8 sps:$4 sm:$0xff]  }
  0x6e   :  { %1667 = vmatpush1.bf16.msra.mxu0 %v2367_v28  ;;  %v60_v28 = vld [vmem:[#allocation3 + $0x28] sm:$0xff] }
  0x6f   :  { %1668 = vmatprep.subr.bf16.mxu0 %v2375_v29  ;;  %1708 = vmatpush1.bf16.msra.mxu1 %v2370_v30  ;;  %v2453_v29 = vld [vmem:[#allocation5 + $0x454] ss:$8 sps:$4 sm:$0xff]   ;;  %v1995_v30 = vcombine.high %v2724_v27, %v2724_v27 }
  0x70   :  { %1709 = vmatprep.subr.bf16.mxu1 %v2378_v31  ;;  %v2729_v31 = vmax.bf16 %v2657_v49, %v60_v28  ;;  %v2537_v28 = vld [vmem:[#allocation5 + $0x674] ss:$8 sps:$4 sm:$0xff]  }
  0x72   :  { %1669 = vmatpush1.bf16.msra.mxu0 %v2373_v32  ;;  %v2448_v32 = vld [vmem:[#allocation5 + $0x560] ss:$8 sps:$4 sm:$0xff]  }
  0x73   :  { %1670 = vmatprep.subr.bf16.mxu0 %v2381_v33  ;;  %1710 = vmatpush1.bf16.msra.mxu1 %v2376_v34  ;;  %v2456_v33 = vld [vmem:[#allocation5 + $0x554] ss:$8 sps:$4 sm:$0xff]   ;;  %v1997_v34 = vcombine.high %v2729_v31, %v2729_v31 }
  0x74   :  { %1711 = vmatprep.subr.bf16.mxu1 %v2384_v35  ;;  %v2451_v35 = vld [vmem:[#allocation5 + $0x450] ss:$8 sps:$4 sm:$0xff]  }
  0x76   :  { %1671 = vmatpush1.bf16.msra.mxu0 %v2379_v37  ;;  %v2454_v37 = vld [vmem:[#allocation5 + $0x550] ss:$8 sps:$4 sm:$0xff]  }
  0x77   :  { %1672 = vmatprep.subr.bf16.mxu0 %v2387_v40  ;;  %1712 = vmatpush1.bf16.msra.mxu1 %v2382_v42  ;;  %v2465_v40 = vld [vmem:[#allocation5 + $0x434] ss:$8 sps:$4 sm:$0xff]  }
  0x78   :  { %1713 = vmatprep.subr.bf16.mxu1 %v2390_v44  ;;  %v2468_v42 = vld [vmem:[#allocation5 + $0x534] ss:$8 sps:$4 sm:$0xff]   ;;  %v2471_v44 = vld [vmem:[#allocation5 + $0x424] ss:$8 sps:$4 sm:$0xff]  }
  0x7a   :  { %1673 = vmatpush1.bf16.msra.mxu0 %v2385_v46  ;;  %v2474_v46 = vld [vmem:[#allocation5 + $0x524] ss:$8 sps:$4 sm:$0xff]  }
  0x7b   :  { %1674 = vmatprep.subr.bf16.mxu0 %v2393_v47  ;;  %1714 = vmatpush1.bf16.msra.mxu1 %v2388_v48  ;;  %v2469_v47 = vld [vmem:[#allocation5 + $0x420] ss:$8 sps:$4 sm:$0xff]   ;;  %v2477_v48 = vld [vmem:[#allocation5 + $0x414] ss:$8 sps:$4 sm:$0xff]  }
  0x7c   :  { %1715 = vmatprep.subr.bf16.mxu1 %v2396_v50  ;;  %v2472_v50 = vld [vmem:[#allocation5 + $0x520] ss:$8 sps:$4 sm:$0xff]  }
  0x7e   :  { %1675 = vmatpush2.bf16.msra.mxu0 %v2391_v51  ;;  %v2480_v51 = vld [vmem:[#allocation5 + $0x514] ss:$8 sps:$4 sm:$0xff]  }
  0x7f   :  { %1676 = vmatprep.subr.bf16.mxu0 %v2399_v52  ;;  %1716 = vmatpush2.bf16.msra.mxu1 %v2394_v53  ;;  %v2475_v52 = vld [vmem:[#allocation5 + $0x410] ss:$8 sps:$4 sm:$0xff]   ;;  %v2483_v53 = vld [vmem:[#allocation5 + $0x404] ss:$8 sps:$4 sm:$0xff]  }
  0x80   :  { %1717 = vmatprep.subr.bf16.mxu1 %v2402_v54  ;;  %v2478_v54 = vld [vmem:[#allocation5 + $0x510] ss:$8 sps:$4 sm:$0xff]  }
  0x82   :  { %1677 = vmatpush2.bf16.msra.mxu0 %v2397_v55  ;;  %v2486_v55 = vld [vmem:[#allocation5 + $0x504] ss:$8 sps:$4 sm:$0xff]  }
  0x83   :  { %1678 = vmatprep.subr.bf16.mxu0 %v2405_v56  ;;  %1718 = vmatpush2.bf16.msra.mxu1 %v2400_v57  ;;  %v2481_v56 = vld [vmem:[#allocation5 + $0x400] ss:$8 sps:$4 sm:$0xff]   ;;  %v2489_v57 = vld [vmem:[#allocation5 + $0x4f4] ss:$8 sps:$4 sm:$0xff]  }
  0x84   :  { %1719 = vmatprep.subr.bf16.mxu1 %v2408_v58  ;;  %v2484_v58 = vld [vmem:[#allocation5 + $0x500] ss:$8 sps:$4 sm:$0xff]  }
  0x86   :  { %1679 = vmatpush2.bf16.msra.mxu0 %v2403_v59  ;;  %v2492_v59 = vld [vmem:[#allocation5 + $0x5f4] ss:$8 sps:$4 sm:$0xff]  }
  0x87   :  { %1680 = vmatprep.subr.bf16.mxu0 %v2411_v60  ;;  %1720 = vmatpush2.bf16.msra.mxu1 %v2406_v61  ;;  %v2487_v60 = vld [vmem:[#allocation5 + $0x4f0] ss:$8 sps:$4 sm:$0xff]   ;;  %v2495_v61 = vld [vmem:[#allocation5 + $0x4e4] ss:$8 sps:$4 sm:$0xff]  }
  0x88   :  { %1721 = vmatprep.subr.bf16.mxu1 %v2414_v62  ;;  %v2490_v62 = vld [vmem:[#allocation5 + $0x5f0] ss:$8 sps:$4 sm:$0xff]  }
  0x8a   :  { %1681 = vmatpush2.bf16.msra.mxu0 %v2409_v63  ;;  %v2498_v63 = vld [vmem:[#allocation5 + $0x5e4] ss:$8 sps:$4 sm:$0xff]  }
  0x8b   :  { %1682 = vmatprep.subr.bf16.mxu0 %v2417_v0  ;;  %1722 = vmatpush2.bf16.msra.mxu1 %v2412_v1  ;;  %v2493_v0 = vld [vmem:[#allocation5 + $0x4e0] ss:$8 sps:$4 sm:$0xff]   ;;  %v2501_v1 = vld [vmem:[#allocation5 + $0x4d4] ss:$8 sps:$4 sm:$0xff]  }
  0x8c   :  { %1723 = vmatprep.subr.bf16.mxu1 %v2420_v2  ;;  %v2496_v2 = vld [vmem:[#allocation5 + $0x5e0] ss:$8 sps:$4 sm:$0xff]  }
  0x8e   :  { %1683 = vmatpush2.bf16.msra.mxu0 %v2415_v3  ;;  %v2504_v3 = vld [vmem:[#allocation5 + $0x5d4] ss:$8 sps:$4 sm:$0xff]  }
  0x8f   :  { %1684 = vmatprep.subr.bf16.mxu0 %v2423_v4  ;;  %1724 = vmatpush2.bf16.msra.mxu1 %v2418_v5  ;;  %v2499_v4 = vld [vmem:[#allocation5 + $0x4d0] ss:$8 sps:$4 sm:$0xff]   ;;  %v2507_v5 = vld [vmem:[#allocation5 + $0x4c4] ss:$8 sps:$4 sm:$0xff]  }
  0x90   :  { %1725 = vmatprep.subr.bf16.mxu1 %v2426_v6  ;;  %v2502_v6 = vld [vmem:[#allocation5 + $0x5d0] ss:$8 sps:$4 sm:$0xff]  }
  0x92   :  { %1685 = vmatpush2.bf16.msra.mxu0 %v2421_v7  ;;  %v2510_v7 = vld [vmem:[#allocation5 + $0x5c4] ss:$8 sps:$4 sm:$0xff]  }
  0x93   :  { %1686 = vmatprep.subr.bf16.mxu0 %v2429_v8  ;;  %1726 = vmatpush2.bf16.msra.mxu1 %v2424_v9  ;;  %v2505_v8 = vld [vmem:[#allocation5 + $0x4c0] ss:$8 sps:$4 sm:$0xff]   ;;  %v2513_v9 = vld [vmem:[#allocation5 + $0x4b4] ss:$8 sps:$4 sm:$0xff]  }
  0x94   :  { %1727 = vmatprep.subr.bf16.mxu1 %v2432_v10  ;;  %v2508_v10 = vld [vmem:[#allocation5 + $0x5c0] ss:$8 sps:$4 sm:$0xff]  }
  0x96   :  { %1687 = vmatpush2.bf16.msra.mxu0 %v2427_v11  ;;  %v2516_v11 = vld [vmem:[#allocation5 + $0x5b4] ss:$8 sps:$4 sm:$0xff]  }
  0x97   :  { %1688 = vmatprep.subr.bf16.mxu0 %v2435_v12  ;;  %1728 = vmatpush2.bf16.msra.mxu1 %v2430_v13  ;;  %v2511_v12 = vld [vmem:[#allocation5 + $0x4b0] ss:$8 sps:$4 sm:$0xff]   ;;  %v2519_v13 = vld [vmem:[#allocation5 + $0x4a4] ss:$8 sps:$4 sm:$0xff]  }
  0x98   :  { %1729 = vmatprep.subr.bf16.mxu1 %v2438_v14  ;;  %v2514_v14 = vld [vmem:[#allocation5 + $0x5b0] ss:$8 sps:$4 sm:$0xff]  }
  0x9a   :  { %1689 = vmatpush2.bf16.msra.mxu0 %v2433_v15  ;;  %v2522_v15 = vld [vmem:[#allocation5 + $0x5a4] ss:$8 sps:$4 sm:$0xff]  }
  0x9b   :  { %1740 = vmatprep.subr.bf16.mxu0 %v2441_v16  ;;  %1730 = vmatpush2.bf16.msra.mxu1 %v2436_v17  ;;  %v2517_v16 = vld [vmem:[#allocation5 + $0x4a0] ss:$8 sps:$4 sm:$0xff]   ;;  %v2525_v17 = vld [vmem:[#allocation5 + $0x494] ss:$8 sps:$4 sm:$0xff]  }
  0x9c   :  { %1781 = vmatprep.subr.bf16.mxu1 %v2444_v19  ;;  %v2528_v19 = vld [vmem:[#allocation5 + $0x594] ss:$8 sps:$4 sm:$0xff]  }
  0x9d   :  { %1691 = vmatmul.mubr.bf16.vlgmr.msra.gmra.mxu0 %v1990_v18  ;;  %v2520_v18 = vld [vmem:[#allocation5 + $0x5a0] ss:$8 sps:$4 sm:$0xff]  }
  0x9e   :  { %1741 = vmatpush1.bf16.msra.mxu0 %v2439_v20  ;;  %1732 = vmatmul.mubr.bf16.vlgmr.msra.gmra.mxu1 %v1992_v21  ;;  %v2523_v20 = vld [vmem:[#allocation5 + $0x490] ss:$8 sps:$4 sm:$0xff]   ;;  %v2531_v21 = vld [vmem:[#allocation5 + $0x484] ss:$8 sps:$4 sm:$0xff]  }
  0x9f   :  { %1742 = vmatprep.subr.bf16.mxu0 %v2447_v22  ;;  %1782 = vmatpush1.bf16.msra.mxu1 %v2442_v23  ;;  %v61_v22 = vld [vmem:[#allocation3 + $0x30] sm:$0xff] }
  0xa0   :  { %1783 = vmatprep.subr.bf16.mxu1 %v2450_v26  ;;  %1772 = vmatprep.mubr.bf16.mxu0 %v1995_v30  ;;  %v2526_v23 = vld [vmem:[#allocation5 + $0x590] ss:$8 sps:$4 sm:$0xff]   ;;  %v2734_v26 = vmax.bf16 %v2657_v49, %v61_v22  ;;  %v1994_v30 = vcombine.low %v2724_v27, %v2724_v27  ;;  %v2543_v27 = vld [vmem:[#allocation5 + $0x654] ss:$8 sps:$4 sm:$0xff]  }
  0xa1   :  { %1813 = vmatprep.mubr.bf16.mxu1 %v1997_v34 }
  0xa2   :  { %1743 = vmatpush1.bf16.msra.mxu0 %v2445_v25  ;;  %v2529_v25 = vld [vmem:[#allocation5 + $0x480] ss:$8 sps:$4 sm:$0xff]   ;;  %v1999_v34 = vcombine.high %v2734_v26, %v2734_v26 }
  0xa3   :  { %1744 = vmatprep.subr.bf16.mxu0 %v2453_v29  ;;  %1784 = vmatpush1.bf16.msra.mxu1 %v2448_v32  ;;  %v2532_v29 = vld [vmem:[#allocation5 + $0x580] ss:$8 sps:$4 sm:$0xff]   ;;  %v2561_v32 = vld [vmem:[#allocation5 + $0x774] ss:$8 sps:$4 sm:$0xff]  }
  0xa4   :  { %1785 = vmatprep.subr.bf16.mxu1 %v2456_v33  ;;  %v2535_v33 = vld [vmem:[#allocation5 + $0x670] ss:$8 sps:$4 sm:$0xff]  }
  0xa6   :  { %1745 = vmatpush1.bf16.msra.mxu0 %v2451_v35  ;;  %v1996_v35 = vcombine.low %v2729_v31, %v2729_v31  ;;  %v2541_v31 = vld [vmem:[#allocation5 + $0x650] ss:$8 sps:$4 sm:$0xff]  }
  0xa7   :  { %1746 = vmatprep.subr.bf16.mxu0 %v2459_v36  ;;  %1786 = vmatpush1.bf16.msra.mxu1 %v2454_v37  ;;  %v2540_v36 = vld [vmem:[#allocation5 + $0x664] ss:$8 sps:$4 sm:$0xff]   ;;  %v2559_v37 = vld [vmem:[#allocation5 + $0x770] ss:$8 sps:$4 sm:$0xff]  }
  0xa8   :  { %1787 = vmatprep.subr.bf16.mxu1 %v2462_v38  ;;  %v2567_v38 = vld [vmem:[#allocation5 + $0x764] ss:$8 sps:$4 sm:$0xff]  }
  0xaa   :  { %1747 = vmatpush1.bf16.msra.mxu0 %v2457_v39  ;;  %v2538_v39 = vld [vmem:[#allocation5 + $0x660] ss:$8 sps:$4 sm:$0xff]  }
  0xab   :  { %1748 = vmatprep.subr.bf16.mxu0 %v2465_v40  ;;  %1788 = vmatpush1.bf16.msra.mxu1 %v2460_v41  ;;  %v2565_v40 = vld [vmem:[#allocation5 + $0x760] ss:$8 sps:$4 sm:$0xff]   ;;  %v2573_v41 = vld [vmem:[#allocation5 + $0x754] ss:$8 sps:$4 sm:$0xff]  }
  0xac   :  { %1789 = vmatprep.subr.bf16.mxu1 %v2468_v42  ;;  %v2546_v42 = vld [vmem:[#allocation5 + $0x644] ss:$8 sps:$4 sm:$0xff]  }
  0xae   :  { %1749 = vmatpush1.bf16.msra.mxu0 %v2463_v43  ;;  %v2571_v43 = vld [vmem:[#allocation5 + $0x750] ss:$8 sps:$4 sm:$0xff]  }
  0xaf   :  { %1750 = vmatprep.subr.bf16.mxu0 %v2471_v44  ;;  %1790 = vmatpush1.bf16.msra.mxu1 %v2466_v45  ;;  %v2579_v44 = vld [vmem:[#allocation5 + $0x744] ss:$8 sps:$4 sm:$0xff]   ;;  %v2544_v45 = vld [vmem:[#allocation5 + $0x640] ss:$8 sps:$4 sm:$0xff]  }
  0xb0   :  { %1791 = vmatprep.subr.bf16.mxu1 %v2474_v46  ;;  %v2549_v46 = vld [vmem:[#allocation5 + $0x634] ss:$8 sps:$4 sm:$0xff]  }
  0xb2   :  { %1751 = vmatpush1.bf16.msra.mxu0 %v2469_v47  ;;  %v2577_v47 = vld [vmem:[#allocation5 + $0x740] ss:$8 sps:$4 sm:$0xff]  }
  0xb3   :  { %1752 = vmatprep.subr.bf16.mxu0 %v2477_v48  ;;  %1792 = vmatpush1.bf16.msra.mxu1 %v2472_v50  ;;  %v2585_v48 = vld [vmem:[#allocation5 + $0x734] ss:$8 sps:$4 sm:$0xff]   ;;  %v2547_v50 = vld [vmem:[#allocation5 + $0x630] ss:$8 sps:$4 sm:$0xff]  }
  0xb4   :  { %1793 = vmatprep.subr.bf16.mxu1 %v2480_v51  ;;  %v2552_v51 = vld [vmem:[#allocation5 + $0x624] ss:$8 sps:$4 sm:$0xff]  }
  0xb6   :  { %1753 = vmatpush1.bf16.msra.mxu0 %v2475_v52  ;;  %v2583_v52 = vld [vmem:[#allocation5 + $0x730] ss:$8 sps:$4 sm:$0xff]  }
  0xb7   :  { %1754 = vmatprep.subr.bf16.mxu0 %v2483_v53  ;;  %1794 = vmatpush1.bf16.msra.mxu1 %v2478_v54  ;;  %v2591_v53 = vld [vmem:[#allocation5 + $0x724] ss:$8 sps:$4 sm:$0xff]   ;;  %v2550_v54 = vld [vmem:[#allocation5 + $0x620] ss:$8 sps:$4 sm:$0xff]  }
  0xb8   :  { %1795 = vmatprep.subr.bf16.mxu1 %v2486_v55  ;;  %v2555_v55 = vld [vmem:[#allocation5 + $0x614] ss:$8 sps:$4 sm:$0xff]  }
  0xba   :  { %1755 = vmatpush1.bf16.msra.mxu0 %v2481_v56  ;;  %v2589_v56 = vld [vmem:[#allocation5 + $0x720] ss:$8 sps:$4 sm:$0xff]  }
  0xbb   :  { %1756 = vmatprep.subr.bf16.mxu0 %v2489_v57  ;;  %1796 = vmatpush1.bf16.msra.mxu1 %v2484_v58  ;;  %v2597_v57 = vld [vmem:[#allocation5 + $0x714] ss:$8 sps:$4 sm:$0xff]   ;;  %v2553_v58 = vld [vmem:[#allocation5 + $0x610] ss:$8 sps:$4 sm:$0xff]  }
  0xbc   :  { %1797 = vmatprep.subr.bf16.mxu1 %v2492_v59  ;;  %v2558_v59 = vld [vmem:[#allocation5 + $0x604] ss:$8 sps:$4 sm:$0xff]  }
  0xbe   :  { %1757 = vmatpush2.bf16.msra.mxu0 %v2487_v60  ;;  %v2595_v60 = vld [vmem:[#allocation5 + $0x710] ss:$8 sps:$4 sm:$0xff]  }
  0xbf   :  { %1758 = vmatprep.subr.bf16.mxu0 %v2495_v61  ;;  %1798 = vmatpush2.bf16.msra.mxu1 %v2490_v62  ;;  %v62_v61 = vld [vmem:[#allocation3 + $0x38] sm:$0xf]  ;;  %v2603_v62 = vld [vmem:[#allocation5 + $0x704] ss:$8 sps:$4 sm:$0xff]  }
  0xc0   :  { %1799 = vmatprep.subr.bf16.mxu1 %v2498_v63  ;;  %v2556_v63 = vld [vmem:[#allocation5 + $0x600] ss:$8 sps:$4 sm:$0xff]  }
  0xc2   :  { %1759 = vmatpush2.bf16.msra.mxu0 %v2493_v0  ;;  %v2564_v0 = vld [vmem:[#allocation5 + $0x6f4] ss:$8 sps:$4 sm:$0xff]  }
  0xc3   :  { %1760 = vmatprep.subr.bf16.mxu0 %v2501_v1  ;;  %1800 = vmatpush2.bf16.msra.mxu1 %v2496_v2  ;;  %v70_v1 = vmax.bf16 %v2657_v49, %v62_v61  ;;  %v2601_v2 = vld [vmem:[#allocation5 + $0x700] ss:$8 sps:$4 sm:$0xff]  }
  0xc4   :  { %1801 = vmatprep.subr.bf16.mxu1 %v2504_v3  ;;  %v2562_v3 = vld [vmem:[#allocation5 + $0x6f0] ss:$8 sps:$4 sm:$0xff]  }
  0xc6   :  { %1761 = vmatpush2.bf16.msra.mxu0 %v2499_v4  ;;  %v2570_v4 = vld [vmem:[#allocation5 + $0x6e4] ss:$8 sps:$4 sm:$0xff]  }
  0xc7   :  { %1762 = vmatprep.subr.bf16.mxu0 %v2507_v5  ;;  %1802 = vmatpush2.bf16.msra.mxu1 %v2502_v6  ;;  %v2000_v5 = vcombine.low %v70_v1, %v70_v1  ;;  %v2568_v6 = vld [vmem:[#allocation5 + $0x6e0] ss:$8 sps:$4 sm:$0xff]  }
  0xc8   :  { %1803 = vmatprep.subr.bf16.mxu1 %v2510_v7  ;;  %v2576_v7 = vld [vmem:[#allocation5 + $0x6d4] ss:$8 sps:$4 sm:$0xff]  }
  0xca   :  { %1763 = vmatpush2.bf16.msra.mxu0 %v2505_v8  ;;  %v2574_v8 = vld [vmem:[#allocation5 + $0x6d0] ss:$8 sps:$4 sm:$0xff]  }
  0xcb   :  { %1764 = vmatprep.subr.bf16.mxu0 %v2513_v9  ;;  %1804 = vmatpush2.bf16.msra.mxu1 %v2508_v10  ;;  %v2582_v9 = vld [vmem:[#allocation5 + $0x6c4] ss:$8 sps:$4 sm:$0xff]   ;;  %v2588_v10 = vld [vmem:[#allocation5 + $0x6b4] ss:$8 sps:$4 sm:$0xff]  }
  0xcc   :  { %1805 = vmatprep.subr.bf16.mxu1 %v2516_v11  ;;  %v2586_v11 = vld [vmem:[#allocation5 + $0x6b0] ss:$8 sps:$4 sm:$0xff]  }
  0xce   :  { %1765 = vmatpush2.bf16.msra.mxu0 %v2511_v12  ;;  %v2594_v12 = vld [vmem:[#allocation5 + $0x6a4] ss:$8 sps:$4 sm:$0xff]  }
  0xcf   :  { %1766 = vmatprep.subr.bf16.mxu0 %v2519_v13  ;;  %1806 = vmatpush2.bf16.msra.mxu1 %v2514_v14  ;;  %v2592_v13 = vld [vmem:[#allocation5 + $0x6a0] ss:$8 sps:$4 sm:$0xff]   ;;  %v313_v14 = vlaneseq }
  0xd0   :  { %1807 = vmatprep.subr.bf16.mxu1 %v2522_v15  ;;  %v2600_v15 = vld [vmem:[#allocation5 + $0x694] ss:$8 sps:$4 sm:$0xff]  }
  0xd2   :  { %1767 = vmatpush2.bf16.msra.mxu0 %v2517_v16  ;;  %v2598_v16 = vld [vmem:[#allocation5 + $0x690] ss:$8 sps:$4 sm:$0xff]  }
  0xd3   :  { %1768 = vmatprep.subr.bf16.mxu0 %v2525_v17  ;;  %1808 = vmatpush2.bf16.msra.mxu1 %v2520_v18  ;;  %v314_v17 = vshrl.u32 %v313_v14, 7  ;;  %v2606_v18 = vld [vmem:[#allocation5 + $0x684] ss:$8 sps:$4 sm:$0xff]  }
  0xd4   :  { %1809 = vmatprep.subr.bf16.mxu1 %v2528_v19  ;;  %v2604_v19 = vld [vmem:[#allocation5 + $0x680] ss:$8 sps:$4 sm:$0xff]  }
  0xd5   :  { %v2749_v22 = vsub.s32 1, %v314_v17 }
  0xd6   :  { %1769 = vmatpush2.bf16.msra.mxu0 %v2523_v20  ;;  %v2744_v20 = vsub.s32 0, %v314_v17 }
  0xd7   :  { %1770 = vmatprep.subr.bf16.mxu0 %v2531_v21  ;;  %1810 = vmatpush2.bf16.msra.mxu1 %v2526_v23  ;;  %v311_v21 = vld [vmem:[%s2775_s2] sm:$0x3]  ;;  %v1998_v23 = vcombine.low %v2734_v26, %v2734_v26 }
  0xd8   :  { %1811 = vmatprep.subr.bf16.mxu1 %v2534_v24  ;;  %v316_v24 = vrot.slane %v311_v21, %v2744_v20 }
  0xda   :  { %1771 = vmatpush2.bf16.msra.mxu0 %v2529_v25  ;;  %v320_v25 = vrot.slane %v311_v21, %v2749_v22 }
  0xdb   :  { %1822 = vmatprep.subr.bf16.mxu0 %v2537_v28  ;;  %1812 = vmatpush2.bf16.msra.mxu1 %v2532_v29 }
  0xdc   :  { %1863 = vmatprep.subr.bf16.mxu1 %v2561_v32 }
  0xdd   :  { %1773 = vmatmul.mubr.bf16.vlgmr.msra.gmra.mxu0 %v1994_v30 }
  0xde   :  { %1823 = vmatpush1.bf16.msra.mxu0 %v2535_v33  ;;  %1854 = vmatprep.mubr.bf16.mxu0 %v1999_v34 }
  0xdf   :  { %1814 = vmatmul.mubr.bf16.vlgmr.msra.gmra.mxu1 %v1996_v35  ;;  %1824 = vmatprep.subr.bf16.mxu0 %v2540_v36 }
  0xe0   :  { %1864 = vmatpush1.bf16.msra.mxu1 %v2559_v37  ;;  %1895 = vmatprep.mubr.bf16.mxu1 %v2657_v49  ;;  %v2580_v49 = vld [vmem:[#allocation5 + $0x6c0] ss:$8 sps:$4 sm:$0xff]  }
  0xe1   :  { %1865 = vmatprep.subr.bf16.mxu1 %v2567_v38 }
  0xe2   :  { %1825 = vmatpush1.bf16.msra.mxu0 %v2538_v39 }
  0xe3   :  { %1826 = vmatprep.subr.bf16.mxu0 %v2543_v27 }
  0xe4   :  { %1866 = vmatpush1.bf16.msra.mxu1 %v2565_v40 }
  0xe5   :  { %1867 = vmatprep.subr.bf16.mxu1 %v2573_v41 }
  0xe6   :  { %1827 = vmatpush1.bf16.msra.mxu0 %v2541_v31 }
  0xe7   :  { %1828 = vmatprep.subr.bf16.mxu0 %v2546_v42 }
  0xe8   :  { %1868 = vmatpush1.bf16.msra.mxu1 %v2571_v43 }
  0xe9   :  { %1869 = vmatprep.subr.bf16.mxu1 %v2579_v44 }
  0xea   :  { %1829 = vmatpush1.bf16.msra.mxu0 %v2544_v45 }
  0xeb   :  { %1830 = vmatprep.subr.bf16.mxu0 %v2549_v46 }
  0xec   :  { %1870 = vmatpush1.bf16.msra.mxu1 %v2577_v47 }
  0xed   :  { %1871 = vmatprep.subr.bf16.mxu1 %v2585_v48 }
  0xee   :  { %1831 = vmatpush1.bf16.msra.mxu0 %v2547_v50 }
  0xef   :  { %1832 = vmatprep.subr.bf16.mxu0 %v2552_v51 }
  0xf0   :  { %1872 = vmatpush1.bf16.msra.mxu1 %v2583_v52 }
  0xf1   :  { %1873 = vmatprep.subr.bf16.mxu1 %v2591_v53 }
  0xf2   :  { %1833 = vmatpush1.bf16.msra.mxu0 %v2550_v54 }
  0xf3   :  { %1834 = vmatprep.subr.bf16.mxu0 %v2555_v55 }
  0xf4   :  { %1874 = vmatpush1.bf16.msra.mxu1 %v2589_v56 }
  0xf5   :  { %1875 = vmatprep.subr.bf16.mxu1 %v2597_v57 }
  0xf6   :  { %1835 = vmatpush1.bf16.msra.mxu0 %v2553_v58 }
  0xf7   :  { %1836 = vmatprep.subr.bf16.mxu0 %v2558_v59 }
  0xf8   :  { %1876 = vmatpush1.bf16.msra.mxu1 %v2595_v60 }
  0xf9   :  { %1877 = vmatprep.subr.bf16.mxu1 %v2603_v62 }
  0xfa   :  { %1837 = vmatpush1.bf16.msra.mxu0 %v2556_v63 }
  0xfb   :  { %1838 = vmatprep.subr.bf16.mxu0 %v2564_v0 }
  0xfc   :  { %1878 = vmatpush1.bf16.msra.mxu1 %v2601_v2 }
  0xfe   :  { %1839 = vmatpush2.bf16.msra.mxu0 %v2562_v3 }
  0xff   :  { %1840 = vmatprep.subr.bf16.mxu0 %v2570_v4  ;;  %1896 = vmatmul.mubr.bf16.vlgmr.msra.gmra.mxu1 %v2000_v5 }
 0x102   :  { %1841 = vmatpush2.bf16.msra.mxu0 %v2568_v6 }
 0x103   :  { %1842 = vmatprep.subr.bf16.mxu0 %v2576_v7 }
 0x106   :  { %1843 = vmatpush2.bf16.msra.mxu0 %v2574_v8 }
 0x107   :  { %1844 = vmatprep.subr.bf16.mxu0 %v2582_v9 }
 0x10a   :  { %1845 = vmatpush2.bf16.msra.mxu0 %v2580_v49 }
 0x10b   :  { %1846 = vmatprep.subr.bf16.mxu0 %v2588_v10 }
 0x10e   :  { %1847 = vmatpush2.bf16.msra.mxu0 %v2586_v11 }
 0x10f   :  { %1848 = vmatprep.subr.bf16.mxu0 %v2594_v12 }
 0x112   :  { %1849 = vmatpush2.bf16.msra.mxu0 %v2592_v13 }
 0x113   :  { %1850 = vmatprep.subr.bf16.mxu0 %v2600_v15 }
 0x116   :  { %1851 = vmatpush2.bf16.msra.mxu0 %v2598_v16 }
 0x117   :  { %1852 = vmatprep.subr.bf16.mxu0 %v2606_v18 }
 0x11a   :  { %1853 = vmatpush2.bf16.msra.mxu0 %v2604_v19 }
 0x11d   :  { %v1610_v28 = vpop.f32.mrf.mxu0  ;;  %1855 = vmatmul.mubr.bf16.vlgmr.msra.gmra.mxu0 %v1998_v23 }
 0x11e   :  { %v1611_v29 = vadd.f32 %v1610_v28, %v316_v24  ;;  %v1651_v32 = vpop.f32.mrf.mxu1  ;;  %v1939_v28 = vld [vmem:[%s2777_s4] sm:$0x3] }
 0x11f   :  { %v1612_v30 = vpop.f32.mrf.mxu0 }
 0x120   :  { %v1613_v33 = vadd.f32 %v1612_v30, %v320_v25  ;;  %v1652_v34 = vadd.f32 %v1651_v32, %v1611_v29  ;;  %v1653_v36 = vpop.f32.mrf.mxu1  ;;  %v1925_v25 = vld [vmem:[%s2776_s3] sm:$0x3] }
 0x121   :  { %v1614_v35 = vpop.f32.mrf.mxu0  ;;  %v1930_v32 = vrot.slane %v1925_v25, %v2744_v20 }
 0x122   :  { %v1654_v37 = vadd.f32 %v1653_v36, %v1613_v33  ;;  %v1655_v39 = vpop.f32.mrf.mxu1  ;;  %v1934_v33 = vrot.slane %v1925_v25, %v2749_v22  ;;  %v1953_v35 = vld [vmem:[%s2778_s5] sm:$0x3] }
 0x123   :  { %v1615_v38 = vpop.f32.mrf.mxu0  ;;  %v1948_v39 = vrot.slane %v1939_v28, %v2749_v22 }
 0x124   :  { %v1656_v27 = vpop.f32.mrf.mxu1  ;;  %v1944_v38 = vrot.slane %v1939_v28, %v2744_v20 }
 0x15d   :  { %v1692_v40 = vpop.f32.mrf.mxu0 }
 0x15e   :  { %v1693_v26 = vadd.f32 %v1692_v40, %v1652_v34  ;;  %v1733_v31 = vpop.f32.mrf.mxu1 }
 0x15f   :  { %v1694_v41 = vpop.f32.mrf.mxu0 }
 0x160   :  { %v1695_v42 = vadd.f32 %v1694_v41, %v1654_v37  ;;  %v1734_v43 = vadd.f32 %v1733_v31, %v1693_v26  ;;  %v1735_v45 = vpop.f32.mrf.mxu1  ;;  %v1958_v26 = vrot.slane %v1953_v35, %v2744_v20  ;;  %v1962_v41 = vrot.slane %v1953_v35, %v2749_v22 }
 0x161   :  { %v1696_v44 = vpop.f32.mrf.mxu0 }
 0x162   :  { %v1736_v46 = vadd.f32 %v1735_v45, %v1695_v42  ;;  %v1737_v48 = vpop.f32.mrf.mxu1 }
 0x163   :  { %v1697_v47 = vpop.f32.mrf.mxu0 }
 0x164   :  { %v1738_v50 = vpop.f32.mrf.mxu1 }
 0x19d   :  { %v1774_v51 = vpop.f32.mrf.mxu0 }
 0x19e   :  { %v1775_v63 = vadd.f32 %v1774_v51, %v1734_v43 }
 0x19f   :  { %v1776_v52 = vpop.f32.mrf.mxu0  ;;  %v1815_v53 = vpop.f32.mrf.mxu1 }
 0x1a0   :  { %v1777_v0 = vadd.f32 %v1776_v52, %v1736_v46  ;;  %v1816_v1 = vadd.f32 %v1815_v53, %v1775_v63  ;;  %v2241_v46 = vld [vmem:[#allocation2] ss:$0 sm:$0xff] }
 0x1a1   :  { %v1778_v54 = vpop.f32.mrf.mxu0  ;;  %v1817_v55 = vpop.f32.mrf.mxu1 }
 0x1a2   :  { %v1818_v3 = vadd.f32 %v1817_v55, %v1777_v0 }
 0x1a3   :  { %v1779_v56 = vpop.f32.mrf.mxu0  ;;  %v1819_v57 = vpop.f32.mrf.mxu1 }
 0x1a5   :  { %v1820_v58 = vpop.f32.mrf.mxu1 }
 0x1bf   :  { %v1897_v59 = vpop.f32.mrf.mxu1 }
 0x1c1   :  { %v1899_v60 = vpop.f32.mrf.mxu1 }
 0x1c3   :  { %v1901_v61 = vpop.f32.mrf.mxu1 }
 0x1c5   :  { %v1902_v62 = vpop.f32.mrf.mxu1 }
 0x1dd   :  { %v1856_v2 = vpop.f32.mrf.mxu0 }
 0x1de   :  { %v1857_v4 = vadd.f32 %v1856_v2, %v1816_v1 }
 0x1df   :  { %v1858_v5 = vpop.f32.mrf.mxu0 }
 0x1e0   :  { %v1898_v6 = vadd.f32 %v1897_v59, %v1857_v4  ;;  %v1859_v7 = vadd.f32 %v1858_v5, %v1818_v3 }
 0x1e1   :  { %v1860_v8 = vpop.f32.mrf.mxu0 }
 0x1e2   :  { %v1900_v9 = vadd.f32 %v1899_v60, %v1859_v7  ;;  %v1904_v10 = vmax.f32 %v1898_v6, 0.0 }
 0x1e3   :  { %v1861_v49 = vpop.f32.mrf.mxu0 }
 0x1e4   :  { %v1905_v11 = vmax.f32 %v1900_v9, 0.0  ;;  %v1911_v14 = vmul.f32 %v1904_v10, %v1904_v10 }
 0x1e6   :  { %v1906_v12 = vadd.f32 %v1905_v11, %v1904_v10  ;;  %v1912_v13 = vmul.f32 %v1905_v11, %v1905_v11 }
 0x1e8   :  { %1907 = vadd.xlane.f32.xlu0 %v1906_v12  ;;  %v1913_v15 = vadd.f32 %v1912_v13, %v1911_v14 }
 0x1ec   :  { %1914 = vadd.xlane.f32.xlu0 %v1913_v15 }
 0x271   :  { %v1908_v16 = vpop.xlane.xlu0 %1907 }
 0x272   :  { %v1910_v17 = vmul.f32 0.00390625, %v1908_v16 }
 0x274   :  { %v1917_v19 = vmul.f32 %v1910_v17, %v1910_v17  ;;  %v1919_v29 = vsub.f32 %v1904_v10, %v1910_v17  ;;  %v1920_v30 = vsub.f32 %v1905_v11, %v1910_v17 }
 0x275   :  { %v1915_v18 = vpop.xlane.xlu0 %1914 }
 0x276   :  { %v1916_v21 = vmul.f32 0.00390625, %v1915_v18 }
 0x278   :  { %v1918_v23 = vsub.f32 %v1916_v21, %v1917_v19 }
 0x27a   :  { %v1921_v24 = vadd.f32 1e-05, %v1918_v23 }
 0x27c   :  { %2607 = vrsqrt.f32 %v1921_v24 }
 0x289   :  { %v2608_v34 = vpop.eup %2607 }
 0x28a   :  { %v1923_v36 = vmul.f32 %v2608_v34, %v1919_v29  ;;  %v1924_v37 = vmul.f32 %v2608_v34, %v1920_v30 }
 0x28c   :  { %v1937_v27 = vmul.f32 %v1930_v32, %v1923_v36  ;;  %v1938_v40 = vmul.f32 %v1934_v33, %v1924_v37 }
 0x28e   :  { %v1951_v31 = vadd.f32 %v1944_v38, %v1937_v27  ;;  %v1952_v42 = vadd.f32 %v1948_v39, %v1938_v40 }
 0x290   :  { %v1965_v43 = vmul.f32 %v1958_v26, %v1951_v31  ;;  %v1966_v44 = vmul.f32 %v1962_v41, %v1952_v42 }
 0x292   :  { %v1967_v45 = vadd.f32 %v1966_v44, %v1965_v43 }
 0x294   :  { %1968 = vadd.xlane.f32.xlu1 %v1967_v45 }
 0x31d   :  { %v1969_v47 = vpop.xlane.xlu1 %1968 }
 0x31e   :  { %v1977_v48 = vadd.f32 %v2241_v46, %v1969_v47 }
 0x320   :  { %1979 = vst.msk [vmem:[%s2780_s7] sm:$0xff] %vm1978_vm0, %v1977_v48 }
 0x321   :  { %1984 = vsyncpa [#allocation4], 1 }
 0x322   :  { %1985 = vsyncpa [#allocation6], 1 }

</bundles_post_ra>
